<compile_context>
chip_gen: v6e
topology: v6e:2x2x1
jax: 0.10.0
libtpu: 0.0.40
codegen_flags: <defaults>
</compile_context>

<pallas_src>
import jax
import jax.numpy as jnp
from jax.experimental import pallas as pl
from jax.experimental.pallas import tpu as pltpu


def _cat_slice_cat_kernel(x_ref, o_ref):
    # x_ref: (N, kc, ts, L)     -- kc channels' spatial slabs of the input
    # o_ref: (2, kc, N, ts, L)  -- both output replicas of the same channels
    kc = x_ref.shape[1]
    for j in range(kc):          # static unroll over channels in this block
        v = x_ref[:, j]          # (N, ts, L): dense vregs (ts mult-of-8, L=128)
        o_ref[0, j] = v
        o_ref[1, j] = v


def _plan(N, C, S, L, itemsize, budget_bytes=8 * 1024 * 1024):
    """Pick (channels per step kc, sublane rows per step ts)."""
    def step_bytes(kc, ts):
        # double-buffered input block + double-buffered 2-replica output block
        return 2 * (kc * N * ts * L + 2 * kc * N * ts * L) * itemsize

    ts = S
    if step_bytes(1, S) > budget_bytes:
        cands = [t for t in range(8, S, 8)
                 if S % t == 0 and step_bytes(1, t) <= budget_bytes]
        if cands:
            ts = max(cands)

    kcs = [k for k in range(1, C + 1)
           if C % k == 0 and step_bytes(k, ts) <= budget_bytes] or [1]
    if C >= 2 and ts == S:
        # Keep at least 2 grid steps so v7x's two TensorCores both get work.
        multi = [k for k in kcs if C // k >= 2]
        if multi:
            return max(multi), ts
    return max(kcs), ts


def cat_slice_cat(x):
    """x: (N, C, H, W) -> (2*C, N*H, W), out[r*C+c, n*H+h, w] = x[n, c, h, w]."""
    N, C, H, W = x.shape
    HW = H * W
    itemsize = jnp.dtype(x.dtype).itemsize

    if HW % 128 == 0:
        # Lane-dense fast path: minor dims (HW//128, 128).
        S, L = HW // 128, 128
    else:
        # Fallback for arbitrary spatial shapes: full-dim minor blocks are
        # always legal (just possibly padded vregs).
        S, L = H, W

    kc, ts = _plan(N, C, S, L, itemsize)
    grid = (C // kc, S // ts)

    x4 = x.reshape(N, C, S, L)   # free, contiguous reshape

    out5 = pl.pallas_call(
        _cat_slice_cat_kernel,
        out_shape=jax.ShapeDtypeStruct((2, C, N, S, L), x.dtype),
        grid_spec=pl.GridSpec(
            grid=grid,
            in_specs=[
                pl.BlockSpec((N, kc, ts, L), lambda i, j: (0, i, j, 0)),
            ],
            out_specs=pl.BlockSpec(
                (2, kc, N, ts, L), lambda i, j: (0, i, 0, j, 0)
            ),
        ),
        compiler_params=pltpu.CompilerParams(
            dimension_semantics=("parallel", "parallel"),
        ),
        cost_estimate=pl.CostEstimate(
            flops=0,
            transcendentals=0,
            bytes_accessed=3 * N * C * HW * itemsize,  # 1 HBM read + 2 writes
        ),
    )(x4)

    # Free, contiguous reshape: (2, C, N, S, L) -> (2*C, N*H, W).
    return out5.reshape(2 * C, N * H, W)


def _reference(x):
    # Pure-JAX reference of the interpreted semantics.
    N, C, H, W = x.shape
    v1 = jnp.concatenate([x[n] for n in range(N)], axis=1)  # (C, N*H, W)
    v2 = v1[:, 0:v1.shape[1]]                               # full slice
    v4 = jnp.concatenate([v1, v2], axis=0)                  # (2*C, N*H, W)
    return v4


if __name__ == "__main__":
    key = jax.random.PRNGKey(0)
    # Small shapes consistent with the module's (1, 3, 64, 64) NCHW input.
    N, C, H, W = 2, 4, 16, 16
    x = jax.random.normal(key, (N, C, H, W), dtype=jnp.float32)

    out = jax.block_until_ready(cat_slice_cat(x))

    ref = _reference(x)
    assert out.shape == (2 * C, N * H, W), out.shape
    assert jnp.allclose(out, ref), "mismatch vs reference"
    print("KERNEL_OK")
</pallas_src>

<mosaic_0001>
module attributes {stable_mosaic.version = 11 : i64} {
  func.func @_cat_slice_cat_kernel(%arg0: i32, %arg1: i32, %arg2: memref<2x2x2x128xf32, #tpu.memory_space<vmem>>, %arg3: memref<2x2x2x2x128xf32, #tpu.memory_space<vmem>>) attributes {dimension_semantics = [#tpu.dimension_semantics<parallel>, #tpu.dimension_semantics<parallel>], iteration_bounds = array<i64: 2, 1>, scalar_prefetch = 0 : i64, scratch_operands = 0 : i64, tpu.core_type = #tpu.core_type<tc>, window_params = [{transform_indices = @transform_0, window_bounds = array<i64: 2, 2, 2, 128>}, {transform_indices = @transform_1, window_bounds = array<i64: 2, 2, 2, 2, 128>}]} {
    %c0 = arith.constant 0 : index
    %c0_0 = arith.constant 0 : index
    %c0_1 = arith.constant 0 : index
    %c0_2 = arith.constant 0 : index
    %0 = vector.load %arg2[%c0, %c0_0, %c0_1, %c0_2] : memref<2x2x2x128xf32, #tpu.memory_space<vmem>>, vector<2x1x2x128xf32>
    %1 = vector.shape_cast %0 : vector<2x1x2x128xf32> to vector<2x2x128xf32>
    %c0_3 = arith.constant 0 : index
    %c0_4 = arith.constant 0 : index
    %c0_5 = arith.constant 0 : index
    %c0_6 = arith.constant 0 : index
    %c0_7 = arith.constant 0 : index
    %2 = vector.load %arg3[%c0_3, %c0_4, %c0_5, %c0_6, %c0_7] : memref<2x2x2x2x128xf32, #tpu.memory_space<vmem>>, vector<1x1x2x2x128xf32>
    %3 = vector.shape_cast %2 : vector<1x1x2x2x128xf32> to vector<2x2x128xf32>
    %4 = vector.shape_cast %1 : vector<2x2x128xf32> to vector<1x1x2x2x128xf32>
    tpu.vector_store %arg3[%c0_3, %c0_4, %c0_5, %c0_6, %c0_7], %4 {strides = array<i32>} : memref<2x2x2x2x128xf32, #tpu.memory_space<vmem>>, vector<1x1x2x2x128xf32>,
    %c1 = arith.constant 1 : index
    %c0_8 = arith.constant 0 : index
    %c0_9 = arith.constant 0 : index
    %c0_10 = arith.constant 0 : index
    %c0_11 = arith.constant 0 : index
    %5 = vector.load %arg3[%c1, %c0_8, %c0_9, %c0_10, %c0_11] : memref<2x2x2x2x128xf32, #tpu.memory_space<vmem>>, vector<1x1x2x2x128xf32>
    %6 = vector.shape_cast %5 : vector<1x1x2x2x128xf32> to vector<2x2x128xf32>
    %7 = vector.shape_cast %1 : vector<2x2x128xf32> to vector<1x1x2x2x128xf32>
    tpu.vector_store %arg3[%c1, %c0_8, %c0_9, %c0_10, %c0_11], %7 {strides = array<i32>} : memref<2x2x2x2x128xf32, #tpu.memory_space<vmem>>, vector<1x1x2x2x128xf32>,
    %c0_12 = arith.constant 0 : index
    %c1_13 = arith.constant 1 : index
    %c0_14 = arith.constant 0 : index
    %c0_15 = arith.constant 0 : index
    %8 = vector.load %arg2[%c0_12, %c1_13, %c0_14, %c0_15] : memref<2x2x2x128xf32, #tpu.memory_space<vmem>>, vector<2x1x2x128xf32>
    %9 = vector.shape_cast %8 : vector<2x1x2x128xf32> to vector<2x2x128xf32>
    %c0_16 = arith.constant 0 : index
    %c1_17 = arith.constant 1 : index
    %c0_18 = arith.constant 0 : index
    %c0_19 = arith.constant 0 : index
    %c0_20 = arith.constant 0 : index
    %10 = vector.load %arg3[%c0_16, %c1_17, %c0_18, %c0_19, %c0_20] : memref<2x2x2x2x128xf32, #tpu.memory_space<vmem>>, vector<1x1x2x2x128xf32>
    %11 = vector.shape_cast %10 : vector<1x1x2x2x128xf32> to vector<2x2x128xf32>
    %12 = vector.shape_cast %9 : vector<2x2x128xf32> to vector<1x1x2x2x128xf32>
    tpu.vector_store %arg3[%c0_16, %c1_17, %c0_18, %c0_19, %c0_20], %12 {strides = array<i32>} : memref<2x2x2x2x128xf32, #tpu.memory_space<vmem>>, vector<1x1x2x2x128xf32>,
    %c1_21 = arith.constant 1 : index
    %c1_22 = arith.constant 1 : index
    %c0_23 = arith.constant 0 : index
    %c0_24 = arith.constant 0 : index
    %c0_25 = arith.constant 0 : index
    %13 = vector.load %arg3[%c1_21, %c1_22, %c0_23, %c0_24, %c0_25] : memref<2x2x2x2x128xf32, #tpu.memory_space<vmem>>, vector<1x1x2x2x128xf32>
    %14 = vector.shape_cast %13 : vector<1x1x2x2x128xf32> to vector<2x2x128xf32>
    %15 = vector.shape_cast %9 : vector<2x2x128xf32> to vector<1x1x2x2x128xf32>
    tpu.vector_store %arg3[%c1_21, %c1_22, %c0_23, %c0_24, %c0_25], %15 {strides = array<i32>} : memref<2x2x2x2x128xf32, #tpu.memory_space<vmem>>, vector<1x1x2x2x128xf32>,
    return
  }
  func.func @transform_0(%arg0: i32, %arg1: i32) -> (i32, i32, i32, i32) {
    %c0_i32 = arith.constant 0 : i32
    %c0_i32_0 = arith.constant 0 : i32
    %c0_i32_1 = arith.constant 0 : i32
    return %c0_i32, %arg0, %arg1, %c0_i32_0 : i32, i32, i32, i32
  }
  func.func @transform_1(%arg0: i32, %arg1: i32) -> (i32, i32, i32, i32, i32) {
    %c0_i32 = arith.constant 0 : i32
    %c0_i32_0 = arith.constant 0 : i32
    %c0_i32_1 = arith.constant 0 : i32
    %c0_i32_2 = arith.constant 0 : i32
    return %c0_i32, %arg0, %c0_i32_0, %arg1, %c0_i32_1 : i32, i32, i32, i32, i32
  }
}

</mosaic_0001>

<bundles_post_ra>
// kernel: tpu_custom_call.1
= control target key start
LH: loop header
LB: loop body
LE: loop exit
PB: predicated region body
PF: predicated region fallthrough
CT: control target
= control target key end

     0   :  { %6 = vsyncpa [#allocation3], 0  ;;  %s648_s0 = inlined_call_operand.hbm [shape: f32[2,4,2,128], index: 0, kind: input, shape index: {}]   ;;  %s649_s1 = inlined_call_operand.hbm [shape: f32[2,4,2,2,128], index: 1, kind: output, shape index: {}]  }
   0x1   :  { %8 = vsyncpa [#allocation3 + $0x1], 0 }
   0x2   :  { %9 = vsyncpa [#allocation4], 0 }
   0x3   :  { %11 = vsyncpa [#allocation4 + $0x1], 0  ;;  %s508_s6 = smov 0   ;;  %s510_s7 = smov 0  }
   0x4   :  { %s512_s8 = smov 0   ;;  %s514_s9 = smov 0  }
   0x5   :  { %s516_s10 = smov 0   ;;  %s518_s11 = smov 0  }
   0x6 LB: > { %s319_s12 = sadd.s32 4294967295, %s484_s11   ;;  %s320_s13 = sadd.s32 4294967294, %s484_s11   ;;  %s484_s11 = sphi %s518_s11, %s17_s11   ;;  %s480_s10 = sphi %s516_s10, %s658_s10   ;;  %s476_s9 = sphi %s514_s9, %s657_s9   ;;  %s472_s8 = sphi %s512_s8, %s656_s8   ;;  %s468_s7 = sphi %s510_s7, %s655_s7   ;;  %s464_s6 = sphi %s508_s6, %s654_s6  }
   0x7   : > { %s29_s14 = sadd.s32 1, %s480_s10  ;;  %s38_s15 = sadd.s32 1, %s472_s8 }
   0x8   : > { %p31_p0 = scmp.ge.s32.totalorder %s29_s14, 2  ;;  %p45_p1 = scmp.ne.s32.totalorder %s472_s8, %s468_s7 }
   0x9   : > { %p46_p2 = scmp.eq.s32.totalorder %s484_s11, 0  ;;  %p51_p3 = scmp.ne.s32.totalorder %s468_s7, %s464_s6 }
   0xa   : > { %s660_s14 = smov (%p31_p0, %s29_s14), 0  ;;  %p52_p5 = scmp.eq.s32.totalorder %s319_s12, 0 }
   0xb   : > { %p549_p4 = por %p46_p2, %p45_p1  ;;  %s33_s17 = ssub.s32 %s480_s10, %s660_s14 }
   0xc   : > { %p77_p6 = scmp.eq.s32.totalorder %s319_s12, 1  ;;  %p36_p7 = scmp.eq.s32.totalorder %s33_s17, 0 }
   0xd   : > { %p555_p8 = por %p52_p5, %p51_p3  ;;  %p83_p10 = scmp.eq.s32.totalorder %s320_s13, 1 }
   0xe   : > { %p559_p9 = por %p77_p6, %p45_p1  ;;  %p322_p12 = scmp.ge.s32.totalorder %s484_s11, 2 }
   0xf   : > { %s564_s20 = scalar_select %p36_p7, %s472_s8, %s38_s15  }
  0x10   : > { %p566_p11 = por %p83_p10, %p51_p3  ;;  %99 = sbr.rel (%p322_p12) target bundleno = 34 (0x22), region = 16 }
  0x15   : > { %s103_s22 = sand.u32 1, %s472_s8   ;;  %s345_s24 = sshll.u32 %s480_s10, 6 }
  0x16   : > { %s323_s23 = sshll.u32 %s103_s22, 3  ;;  %s114_s28 = scalar_lea.hbm %s648_s0, %s345_s24 }
  0x17   : > { %s348_s25 = scalar_select %p549_p4, [#allocation0], [#allocation10] }
  0x18   : > { %s107_s30 = scalar_lea.vmem [#allocation2], %s323_s23  ;;  %s486_s3 = smov 128  }
  0x19   : > { %s119_s29 = sld [smem:[%s348_s25]]   ;;  %s127_s2 = sshll.u32 %s107_s30, 4  ;;  %s128_s2 = int_to_ptr.vmem [resolvable:$true] %s127_s2 }
  0x1a   : > { %349 = sst [smem:[#allocation7]] (%p549_p4), %s486_s3  ;;  %s487_s4 = smov 64  }
  0x1b   : > { %350 = sst [smem:[#allocation7 + $0x1]] (%p549_p4), %s487_s4  ;;  %s488_s5 = smov 2  }
  0x1c   : > { %351 = sst [smem:[#allocation7 + $0x2]] (%p549_p4), %s488_s5  ;;  %s489_s12 = smov 32  }
  0x1d   : > { %352 = sst [smem:[#allocation7 + $0x3]] (%p549_p4), %s489_s12  ;;  %s104_s17 = scalar_lea.sflag [#allocation3], %s103_s22 }
  0x1e   : > { %353 = sst [smem:[#allocation7 + $0x4]] (%p549_p4), %s489_s12  ;;  %s490_s23 = smov 131072  }
  0x1f   : > { %s326_s13 = sshll.u32 %s119_s29, 26  ;;  %354 = sst [smem:[#allocation7 + $0x5]] (%p549_p4), %s488_s5 }
  0x20   : > { %s327_s15 = sadd.s32 134217728, %s326_s13 }
  0x21   : > { %355 = dma.general (%p549_p4), %s114_s28, 128, %s128_s2, %s104_s17, %s490_s23, [#allocation7], %s327_s15, 0  }
  0x22 PF: > { %p328_p13 = scmp.ge.s32.totalorder %s484_s11, 1  ;;  %p148_p0 = scmp.lt.s32.totalorder %s484_s11, 3 }
  0x24   : > { %p149_p1 = pnand %p328_p13, %p148_p0 }
  0x25   : > { %s597_s24 = sand.u32 (!%p149_p1), 1, %s468_s7  }
  0x26   : > { %152 = sbr.rel (%p149_p1) target bundleno = 59 (0x3b), region = 24  ;;  %s329_s25 = sshll.u32 (!%p149_p1), %s597_s24, 3 }
  0x27   : > { %s155_s26 = scalar_lea.sflag (!%p149_p1), [#allocation3], %s597_s24  ;;  %s158_s27 = scalar_lea.vmem (!%p149_p1), [#allocation2], %s329_s25 }
  0x2b   : > { %455 = dma.done.wait (%p555_p8), %s155_s26, 128  }
  0x2c   : > { %457 = vsyncadd (%p555_p8), %s155_s26, 4294967168  ;;  %s330_s16 = sshll.u32 %s597_s24, 4  ;;  %v179_v0 = vld [vmem:[%s158_s27] sm:$0x3]  ;;  %v180_v1 = vld [vmem:[%s158_s27 + $0x4] sm:$0x3] }
  0x2d   : > { %v333_v2 = vld [vmem:[%s158_s27 + $0x2] sm:$0x3]  ;;  %s176_s22 = scalar_lea.vmem [#allocation5], %s330_s16  ;;  %v334_v3 = vld [vmem:[%s158_s27 + $0x6] sm:$0x3]  ;;  %s196_s28 = scalar_lea.sflag [#allocation4], %s597_s24 }
  0x2e   : > { %181 = vst [vmem:[%s176_s22] sm:$0x3] %v179_v0  ;;  %331 = vst [vmem:[%s176_s22 + $0x8] sm:$0x3] %v179_v0 }
  0x2f   : > { %182 = vst [vmem:[%s176_s22 + $0x2] sm:$0x3] %v180_v1  ;;  %332 = vst [vmem:[%s176_s22 + $0xa] sm:$0x3] %v180_v1 }
  0x30   : > { %335 = vst [vmem:[%s176_s22 + $0x4] sm:$0x3] %v333_v2  ;;  %337 = vst [vmem:[%s176_s22 + $0xc] sm:$0x3] %v333_v2 }
  0x31   : > { %336 = vst [vmem:[%s176_s22 + $0x6] sm:$0x3] %v334_v3  ;;  %338 = vst [vmem:[%s176_s22 + $0xe] sm:$0x3] %v334_v3 }
  0x32   : > { %s347_s18 = sshll.u32 %s476_s9, 7  ;;  %s221_s29 = sshll.u32 %s176_s22, 4  ;;  %s222_s29 = int_to_ptr.vmem [resolvable:$true] %s221_s29 }
  0x33   : > { %s210_s3 = scalar_lea.hbm %s649_s1, %s347_s18  ;;  %s491_s4 = smov 128  }
  0x34   : > { %357 = sst [smem:[#allocation9]] (%p559_p9), %s491_s4  ;;  %s492_s5 = smov 256  }
  0x35   : > { %358 = sst [smem:[#allocation9 + $0x1]] (%p559_p9), %s492_s5  ;;  %s493_s12 = smov 4  }
  0x36   : > { %359 = sst [smem:[#allocation9 + $0x2]] (%p559_p9), %s493_s12  ;;  %s494_s13 = smov 32  }
  0x37   : > { %360 = sst [smem:[#allocation9 + $0x3]] (%p559_p9), %s494_s13  ;;  %s495_s9 = smov 2  }
  0x38   : > { %361 = sst [smem:[#allocation9 + $0x4]] (%p559_p9), %s494_s13  ;;  %s496_s15 = smov 131072  }
  0x39   : > { %362 = sst [smem:[#allocation9 + $0x5]] (%p559_p9), %s495_s9  ;;  %s497_s17 = smov 0  }
  0x3a   : > { %363 = dma.general (%p559_p9), %s222_s29, 256, %s210_s3, %s196_s28, %s496_s15, [#allocation9], %s497_s17, 0  }
  0x3b PF: > { %s249_s23 = sand.u32 1, %s464_s6   ;;  %p366_p2 = pnand %p322_p12, %p566_p11 }
  0x3c   : > { %s250_s24 = scalar_lea.sflag [#allocation4], %s249_s23 }
  0x3d   : > { %p367_p3 = pneg %p366_p2 }
  0x3f   : > { %459 = dma.done.wait (%p367_p3), %s250_s24, 256  }
  0x40   : > { %461 = vsyncadd (%p367_p3), %s250_s24, 4294967040  ;;  %s17_s11 = sadd.s32 1, %s484_s11   ;;  %s654_s6 = smov %s468_s7 }
  0x41   : > { %p14_p4 = scmp.ge.s32.totalorder %s17_s11, 4   ;;  %s655_s7 = smov %s472_s8 }
  0x42   : > { %s656_s8 = smov %s564_s20  ;;  %s657_s9 = smov %s480_s10 }
  0x43   : > { %s658_s10 = smov %s660_s14  ;;  %16 = sbr.rel (!%p14_p4) target bundleno = 6 (0x6), region = 83 }
  0x48   :  { %255 = vsyncpa [#allocation3], 1 }
  0x49   :  { %257 = vsyncpa [#allocation3 + $0x1], 1 }
  0x4a   :  { %258 = vsyncpa [#allocation4], 1 }
  0x4b   :  { %260 = vsyncpa [#allocation4 + $0x1], 1 }

</bundles_post_ra>
